<compile_context>
chip_gen: v5e
topology: v5e:2x2
jax: 0.10.0
libtpu: 0.0.40
codegen_flags: <defaults>
</compile_context>

<pallas_src>
import functools

import jax
import jax.numpy as jnp
from jax.experimental import pallas as pl
from jax.experimental.pallas import tpu as pltpu


def _edge_del_kernel(vals_ref, deg_ref, *out_refs, max_edges_num, emit_soft):
    if emit_soft:
        soft_ref, del_ref = out_refs
    else:
        (del_ref,) = out_refs

    vals = vals_ref[...]                                   # [TN, K] f32
    deg = deg_ref[...]                                     # [TN, 1] i32
    K = vals.shape[-1]

    col = jax.lax.broadcasted_iota(jnp.int32, vals.shape, 1)
    mask = col < deg                                       # valid incoming-edge slots

    pos_big = jnp.float32(1e30)

    # ---- two smallest valid slots per row ----
    # softmax is monotone, so the two smallest softmax weights are exactly the
    # two smallest raw values; selecting on raw values keeps the delete mask off
    # the exp/sum/reciprocal path and avoids underflow-induced ties.
    v1 = jnp.where(mask, vals, pos_big)
    min1 = jnp.min(v1, axis=-1, keepdims=True)
    idx1 = jnp.min(jnp.where(v1 == min1, col, K), axis=-1, keepdims=True)
    sel1 = col == idx1
    v2 = jnp.where(sel1, pos_big, v1)
    min2 = jnp.min(v2, axis=-1, keepdims=True)
    idx2 = jnp.min(jnp.where(v2 == min2, col, K), axis=-1, keepdims=True)
    sel2 = col == idx2

    # NOTE: max_edges_num == 0 with deg == 1 deletes a single edge (idx1 == idx2);
    # the PyTorch reference would raise on topk(2) of a 1-element tensor.
    # Sentinel +/-1e30 assumes edge features stay well inside that range.
    cut = mask & (deg > jnp.int32(max_edges_num))          # rows that lose 2 edges
    del_ref[...] = (cut & (sel1 | sel2)).astype(jnp.int8)

    if emit_soft:
        # ---- masked softmax over the valid slots of each row ----
        neg_big = jnp.float32(-1e30)
        masked_vals = jnp.where(mask, vals, neg_big)
        row_max = jnp.max(masked_vals, axis=-1, keepdims=True)
        exps = jnp.where(mask, jnp.exp(masked_vals - row_max), 0.0)
        denom = jnp.sum(exps, axis=-1, keepdims=True)
        inv = pl.reciprocal(jnp.maximum(denom, jnp.float32(1e-30)), approx=False)
        soft_ref[...] = exps * inv


def _pick_tile_n(n, k):
    # Target ~512K f32 elements per row tile: large enough that the ~0.35 us
    # per-grid-step overhead is a small fraction of step time even on v7x's
    # 3.2 TB/s HBM, small enough that double-buffered I/O (vals + lane-padded
    # degree column + outputs) plus the handful of full-tile temporaries stays
    # well inside the explicit vmem_limit_bytes set below on every generation.
    t = (512 * 1024) // max(k, 128)
    t = max(32, min(4096, (t // 32) * 32))        # multiple of 32 (int8 output tiling)
    t = min(t, max(32, (n // 32) * 32))           # never exceed the row count
    # Prefer >= 4 row tiles so the "parallel" grid axis gives v7x's two
    # TensorCores reasonably balanced work.
    while t >= 64 and pl.cdiv(n, t) < 4:
        t = max(32, ((t // 2) // 32) * 32)
    return t


def edge_del_pallas(vals, degrees, max_edges_num, *, return_soft=False, tile_n=None,
                    vmem_limit_bytes=48 * 1024 * 1024):
    """vals: [N, K] float32 (K multiple of 128); degrees: [N] int32.

    Returns the int8 delete mask; with return_soft=True returns (soft, delete).
    """
    N, K = vals.shape
    assert K % 128 == 0, "padded incoming-edge axis must be a multiple of 128"
    degrees = degrees.astype(jnp.int32)

    # Tiny-graph fallback: bring the row count up to one int8 sublane tile.
    # Costs < 16 KiB of HBM traffic and is dead for any realistically sized graph.
    n_req = N
    if N < 32:
        vals = jnp.pad(vals, ((0, 32 - N), (0, 0)))
        degrees = jnp.pad(degrees, (0, 32 - N))
        N = 32

    if tile_n is None:
        tile_n = _pick_tile_n(N, K)
    grid = pl.cdiv(N, tile_n)

    # Pad ONLY the per-row degree vector (4 B/row) so the ragged tail block sees
    # degree 0 deterministically.  `vals` and the outputs stay unpadded: Pallas
    # pads reads / masks writes for the ragged last block, which removes the
    # full-array jnp.pad and output-slice HBM copies of the previous version.
    n_pad = grid * tile_n
    if n_pad != N:
        degrees = jnp.pad(degrees, (0, n_pad - N))
    deg2d = degrees.reshape(n_pad, 1)

    kernel = functools.partial(_edge_del_kernel,
                               max_edges_num=int(max_edges_num),
                               emit_soft=return_soft)

    row_spec = pl.BlockSpec((tile_n, K), lambda i: (i, 0))
    deg_spec = pl.BlockSpec((tile_n, 1), lambda i: (i, 0))

    if return_soft:
        out_shape = (jax.ShapeDtypeStruct((N, K), jnp.float32),
                     jax.ShapeDtypeStruct((N, K), jnp.int8))
        out_specs = (row_spec, row_spec)
    else:
        out_shape = jax.ShapeDtypeStruct((N, K), jnp.int8)
        out_specs = row_spec

    soft_bytes = N * K * 4 if return_soft else 0
    cost = pl.CostEstimate(
        flops=(20 if return_soft else 12) * N * K,
        transcendentals=(N * K) if return_soft else 0,
        bytes_accessed=N * K * 4 + n_pad * 4 + N * K * 1 + soft_bytes,
    )

    out = pl.pallas_call(
        kernel,
        out_shape=out_shape,
        grid_spec=pltpu.PrefetchScalarGridSpec(
            num_scalar_prefetch=0,
            grid=(grid,),
            in_specs=[row_spec, deg_spec],
            out_specs=out_specs,
        ),
        compiler_params=pltpu.CompilerParams(
            dimension_semantics=("parallel",),
            vmem_limit_bytes=vmem_limit_bytes,
        ),
        cost_estimate=cost,
    )(vals, deg2d)

    if return_soft:
        soft, delete = out
        if n_req != N:
            soft, delete = soft[:n_req], delete[:n_req]
        return soft, delete
    delete = out
    if n_req != N:
        delete = delete[:n_req]
    return delete


# TODO(synk): the actual graph mutation (g.remove_edges / DGL adjacency queries)
# is data-dependent graph surgery with no Pallas equivalent; the kernel returns
# a delete mask that the (host-side) caller applies to its edge list.

if __name__ == "__main__":
    key = jax.random.PRNGKey(0)
    k1, k2 = jax.random.split(key)

    # Small synthetic graph: 48 destination nodes (deliberately NOT a multiple of
    # the 32-row tile so the ragged-tail path is exercised), K=128 padded
    # incoming-edge slots per node, max_edges_num = 3.
    N, K = 48, 128
    max_edges_num = 3

    degrees = jax.random.randint(k1, (N,), minval=1, maxval=7)        # in-degrees 1..6
    slot = jnp.arange(K)[None, :]
    valid = slot < degrees[:, None]                                   # [N, K] bool
    vals = jnp.where(valid, jax.random.normal(k2, (N, K), dtype=jnp.float32), 0.0)

    # Fast path (what the module actually needs): delete mask only.
    delete = edge_del_pallas(vals, degrees, max_edges_num)
    # Diagnostic path: also emit the per-row softmax.
    soft, delete2 = edge_del_pallas(vals, degrees, max_edges_num, return_soft=True)
    jax.block_until_ready((delete, soft, delete2))

    # --- host-side sanity checks (not part of the kernel) ---
    assert jnp.array_equal(delete, delete2)

    row_sums = jnp.sum(soft, axis=-1)
    assert jnp.allclose(row_sums, 1.0, atol=1e-4)

    dels_per_row = jnp.sum(delete.astype(jnp.int32), axis=-1)
    expected = jnp.where(degrees > max_edges_num, 2, 0)
    assert jnp.array_equal(dels_per_row, expected)

    # Reference delete mask: two smallest valid raw values per cut row.
    masked_vals = jnp.where(valid, vals, jnp.inf)
    two_smallest = jnp.argsort(masked_vals, axis=-1)[:, :2]
    ref = jnp.zeros((N, K), dtype=bool).at[jnp.arange(N)[:, None], two_smallest].set(True)
    ref = ref & valid & (degrees > max_edges_num)[:, None]
    assert jnp.array_equal(delete.astype(bool), ref)

    print("KERNEL_OK")
</pallas_src>

<mosaic_0001>
module attributes {stable_mosaic.version = 11 : i64} {
  func.func @_edge_del_kernel(%arg0: i32, %arg1: memref<32x128xf32, #tpu.memory_space<vmem>>, %arg2: memref<32x1xi32, #tpu.memory_space<vmem>>, %arg3: memref<32x128xi8, #tpu.memory_space<vmem>>) attributes {dimension_semantics = [#tpu.dimension_semantics<parallel>], iteration_bounds = array<i64: 2>, scalar_prefetch = 0 : i64, scratch_operands = 0 : i64, tpu.core_type = #tpu.core_type<tc>, window_params = [{transform_indices = @transform_0, window_bounds = array<i64: 32, 128>}, {transform_indices = @transform_1, window_bounds = array<i64: 32, 1>}, {transform_indices = @transform_2, window_bounds = array<i64: 32, 128>}]} {
    %c0 = arith.constant 0 : index
    %c0_0 = arith.constant 0 : index
    %0 = vector.load %arg1[%c0, %c0_0] : memref<32x128xf32, #tpu.memory_space<vmem>>, vector<32x128xf32>
    %c0_1 = arith.constant 0 : index
    %c0_2 = arith.constant 0 : index
    %1 = vector.load %arg2[%c0_1, %c0_2] : memref<32x1xi32, #tpu.memory_space<vmem>>, vector<32x1xi32>
    %2 = tpu.iota {dimensions = array<i32: 1>} : vector<32x128xi32>
    %3 = vector.broadcast %1 : vector<32x1xi32> to vector<32x128xi32>
    %4 = arith.cmpi slt, %2, %3 : vector<32x128xi32>
    %cst = arith.constant 1.000000e+30 : f32
    %5 = vector.broadcast %cst : f32 to vector<32x128xf32>
    %6 = arith.select %4, %0, %5 : vector<32x128xi1>, vector<32x128xf32>
    %cst_3 = arith.constant dense<0x7F800000> : vector<32xf32>
    %7 = vector.multi_reduction <minimumf>, %6, %cst_3 [1] : vector<32x128xf32> to vector<32xf32>
    %8 = vector.shape_cast %7 : vector<32xf32> to vector<32x1xf32>
    %9 = vector.broadcast %8 : vector<32x1xf32> to vector<32x128xf32>
    %10 = arith.cmpf oeq, %6, %9 : vector<32x128xf32>
    %c128_i32 = arith.constant 128 : i32
    %11 = vector.broadcast %c128_i32 : i32 to vector<32x128xi32>
    %12 = arith.select %10, %2, %11 : vector<32x128xi1>, vector<32x128xi32>
    %cst_4 = arith.constant dense<2147483647> : vector<32xi32>
    %13 = vector.multi_reduction <minsi>, %12, %cst_4 [1] : vector<32x128xi32> to vector<32xi32>
    %14 = vector.shape_cast %13 : vector<32xi32> to vector<32x1xi32>
    %15 = vector.broadcast %14 : vector<32x1xi32> to vector<32x128xi32>
    %16 = arith.cmpi eq, %2, %15 : vector<32x128xi32>
    %cst_5 = arith.constant 1.000000e+30 : f32
    %17 = vector.broadcast %cst_5 : f32 to vector<32x128xf32>
    %18 = arith.select %16, %17, %6 : vector<32x128xi1>, vector<32x128xf32>
    %cst_6 = arith.constant dense<0x7F800000> : vector<32xf32>
    %19 = vector.multi_reduction <minimumf>, %18, %cst_6 [1] : vector<32x128xf32> to vector<32xf32>
    %20 = vector.shape_cast %19 : vector<32xf32> to vector<32x1xf32>
    %21 = vector.broadcast %20 : vector<32x1xf32> to vector<32x128xf32>
    %22 = arith.cmpf oeq, %18, %21 : vector<32x128xf32>
    %c128_i32_7 = arith.constant 128 : i32
    %23 = vector.broadcast %c128_i32_7 : i32 to vector<32x128xi32>
    %24 = arith.select %22, %2, %23 : vector<32x128xi1>, vector<32x128xi32>
    %cst_8 = arith.constant dense<2147483647> : vector<32xi32>
    %25 = vector.multi_reduction <minsi>, %24, %cst_8 [1] : vector<32x128xi32> to vector<32xi32>
    %26 = vector.shape_cast %25 : vector<32xi32> to vector<32x1xi32>
    %27 = vector.broadcast %26 : vector<32x1xi32> to vector<32x128xi32>
    %28 = arith.cmpi eq, %2, %27 : vector<32x128xi32>
    %c3_i32 = arith.constant 3 : i32
    %29 = vector.broadcast %c3_i32 : i32 to vector<32x1xi32>
    %30 = arith.cmpi sgt, %1, %29 : vector<32x1xi32>
    %31 = vector.broadcast %30 : vector<32x1xi1> to vector<32x128xi1>
    %32 = arith.andi %4, %31 : vector<32x128xi1>
    %33 = arith.ori %16, %28 : vector<32x128xi1>
    %34 = arith.andi %32, %33 : vector<32x128xi1>
    %35 = arith.extui %34 : vector<32x128xi1> to vector<32x128xi8>
    %c0_9 = arith.constant 0 : index
    %c0_10 = arith.constant 0 : index
    %36 = vector.load %arg3[%c0_9, %c0_10] : memref<32x128xi8, #tpu.memory_space<vmem>>, vector<32x128xi8>
    tpu.vector_store %arg3[%c0_9, %c0_10], %35 {strides = array<i32>} : memref<32x128xi8, #tpu.memory_space<vmem>>, vector<32x128xi8>,
    return
  }
  func.func @transform_0(%arg0: i32) -> (i32, i32) {
    %c0_i32 = arith.constant 0 : i32
    %c0_i32_0 = arith.constant 0 : i32
    return %arg0, %c0_i32 : i32, i32
  }
  func.func @transform_1(%arg0: i32) -> (i32, i32) {
    %c0_i32 = arith.constant 0 : i32
    %c0_i32_0 = arith.constant 0 : i32
    return %arg0, %c0_i32 : i32, i32
  }
  func.func @transform_2(%arg0: i32) -> (i32, i32) {
    %c0_i32 = arith.constant 0 : i32
    %c0_i32_0 = arith.constant 0 : i32
    return %arg0, %c0_i32 : i32, i32
  }
}

</mosaic_0001>

<bundles_post_ra>
// kernel: tpu_custom_call.1
= control target key start
LH: loop header
LB: loop body
LE: loop exit
PB: predicated region body
PF: predicated region fallthrough
CT: control target
= control target key end

     0   :  { %7 = vsyncpa [#allocation3], 0  ;;  %s958_s0 = inlined_call_operand.vmem [shape: f32[48,128], index: 0, kind: input, shape index: {}]   ;;  %s959_s1 = inlined_call_operand.vmem [shape: s32[64,1], index: 1, kind: input, shape index: {}]   ;;  %s960_s2 = inlined_call_operand.hbm [shape: s8[48,128], index: 2, kind: output, shape index: {}]  }
   0x1   :  { %9 = vsyncpa [#allocation3 + $0x1], 0  ;;  %s692_s9 = smov 0   ;;  %s694_s10 = smov 0  }
   0x2   :  { %s696_s11 = smov 0   ;;  %s698_s12 = smov 0  }
   0x3 LB: > { %s713_s13 = sadd.s32 4294967295, %s671_s12   ;;  %s535_s14 = sadd.s32 4294967294, %s671_s12   ;;  %s671_s12 = sphi %s698_s12, %s975_s12   ;;  %s667_s11 = sphi %s696_s11, %s974_s11   ;;  %s663_s10 = sphi %s694_s10, %s973_s10   ;;  %s659_s9 = sphi %s692_s9, %s972_s9  }
   0x4   : > { %s717_s15 = sadd.s32 1, %s671_s12   ;;  %s74_s16 = sadd.s32 1, %s667_s11 }
   0x5   : > { %s71_s17 = ssub.s32 %s671_s12, %s717_s15  ;;  %p84_p0 = scmp.ne.s32.totalorder %s667_s11, %s663_s10 }
   0x6   : > { %p72_p1 = scmp.eq.s32.totalorder %s71_s17, 0  ;;  %p85_p2 = scmp.eq.s32.totalorder %s713_s13, 1 }
   0x7   : > { %p90_p3 = scmp.ne.s32.totalorder %s663_s10, %s659_s9  ;;  %p91_p4 = scmp.eq.s32.totalorder %s535_s14, 1 }
   0x8   : > { %s728_s18 = scalar_select %p72_p1, %s667_s11, %s74_s16  }
   0x9   : > { %p730_p5 = por %p85_p2, %p84_p0  ;;  %p734_p6 = por %p91_p4, %p90_p3 }
   0xa   : > { %p538_p7 = scmp.ge.s32.totalorder %s671_s12, 1  ;;  %p135_p8 = scmp.lt.s32.totalorder %s671_s12, 3 }
   0xc   : > { %p136_p9 = pnand %p538_p7, %p135_p8 }
   0xd   : > { %s741_s21 = sshll.u32 (!%p136_p9), %s713_s13, 2  ;;  %s163_s4 = sand.u32 (!%p136_p9), 1, %s663_s10  }
   0xe   : > { %139 = sbr.rel (%p136_p9) target bundleno = 957 (0x3bd), region = 28  ;;  %p181_p10 = scmp.lt.s32.totalorder (!%p136_p9), %s741_s21, 7 }
   0xf   : > { %p171_p11 = scmp.lt.s32.totalorder (!%p136_p9), %s741_s21, 5  ;;  %s539_s5 = sshll.u32 (!%p136_p9), %s163_s4, 3 }
  0x10   : > { %s165_s6 = scalar_lea.vmem (!%p136_p9), [#allocation2], %s539_s5  ;;  %s898_s7 = scalar_lea.sflag (!%p136_p9), [#allocation3], %s163_s4 }
  0x13   : > { %v673_v0 = vmov 0   ;;  %s182_s22 = scalar_select %p181_p10, %s741_s21, 7  ;;  %v201_v5 = vlaneseq }
  0x14   : > { %596 = vset.pattern.permute.xlu1 %v673_v0  ;;  %595 = vset.pattern.permute.xlu0 %v673_v0  ;;  %s172_s27 = scalar_select %p171_p11, %s741_s21, 5 }
  0x15   : > { %597 = vset.pattern.permute.xlu2 %v673_v0  ;;  %s543_s23 = sshll.u32 %s182_s22, 3  ;;  %v768_v6 = vand.u32 127, %v201_v5  ;;  %s447_s8 = ssub.s32 (%p730_p5), 6, %s741_s21 }
  0x16   : > { %s184_s26 = scalar_lea.vmem %s959_s1, %s543_s23  ;;  %s541_s28 = sshll.u32 %s172_s27, 3 }
  0x17   : > { %v751_v1 = vld [vmem:[%s184_s26 + $0x10] sm:$0xff]  ;;  %v753_v2 = vld [vmem:[%s184_s26] sm:$0xff]  ;;  %v757_v3 = vld [vmem:[%s184_s26 + $0x18] sm:$0xff]  ;;  %s174_s3 = scalar_lea.vmem %s958_s0, %s541_s28  ;;  %p448_p12 = scmp.lt.s32.totalorder (%p730_p5), %s447_s8, 4 }
  0x18   : > { %210 = vperm.xlu1 %596, %v751_v1   ;;  %204 = vperm.xlu0 %595, %v753_v2   ;;  %v759_v4 = vld [vmem:[%s184_s26 + $0x8] sm:$0xff]  ;;  %v195_v7 = vld [vmem:[%s174_s3 + $0x10] sm:$0xff]  ;;  %v193_v8 = vld [vmem:[%s174_s3] sm:$0xff] }
  0x19   : > { %v196_v13 = vld [vmem:[%s174_s3 + $0x18] sm:$0xff]  ;;  %v194_v14 = vld [vmem:[%s174_s3 + $0x8] sm:$0xff] }
  0x20   : > { %213 = vperm.xlu1 %596, %v757_v3   ;;  %207 = vperm.xlu0 %595, %v759_v4  }
  0x8a   : > { %v770_v9 = vpop.permute.xlu1 %210  ;;  %v772_v10 = vpop.permute.xlu0 %204 }
  0x8b   : > { %vm961_vm0 = vcmp.lt.s32.totalorder %v768_v6, %v770_v9  ;;  %vm215_vm1 = vcmp.lt.s32.totalorder %v768_v6, %v772_v10 }
  0x8c   : > { %v781_v11 = vsel %vm961_vm0, %v195_v7, 1e+30  ;;  %v786_v12 = vsel %vm215_vm1, %v193_v8, 1e+30 }
  0x8d   : > { %227 = vmin.xlane.f32.xlu0 %v781_v11  ;;  %223 = vmin.xlane.f32.xlu2 %v786_v12 }
  0x92   : > { %v790_v15 = vpop.permute.xlu1 %213  ;;  %v792_v16 = vpop.permute.xlu0 %207 }
  0x93   : > { %vm964_vm2 = vcmp.lt.s32.totalorder %v768_v6, %v790_v15  ;;  %vm216_vm3 = vcmp.lt.s32.totalorder %v768_v6, %v792_v16 }
  0x94   : > { %v801_v17 = vsel %vm964_vm2, %v196_v13, 1e+30  ;;  %v806_v18 = vsel %vm216_vm3, %v194_v14, 1e+30 }
  0x95   : > { %229 = vmin.xlane.f32.xlu1 %v801_v17  ;;  %225 = vmin.xlane.f32.xlu2 %v806_v18 }
 0x100   : > { %v224_v19 = vpop.xlane.xlu2 %223  ;;  %v228_v23 = vpop.xlane.xlu0 %227 }
 0x101   : > { %vm231_vm4 = vcmp.eq.f32.partialorder %v786_v12, %v224_v19  ;;  %vm233_vm6 = vcmp.eq.f32.partialorder %v781_v11, %v228_v23 }
 0x102   : > { %v235_v20 = vsel %vm231_vm4, %v768_v6, 128  ;;  %v237_v28 = vsel %vm233_vm6, %v768_v6, 128 }
 0x103   : > { %v240_v21 = vshra.s32 %v235_v20, 16  ;;  %v268_v30 = vshra.s32 %v237_v28, 16  ;;  %v239_v35 = vand.u32 65535, %v235_v20  ;;  %v267_v43 = vand.u32 65535, %v237_v28 }
 0x105   : > { %v242_v22 = vcvt.s32.f32 %v240_v21  ;;  %v270_v31 = vcvt.s32.f32 %v268_v30  ;;  %v241_v37 = vcvt.s32.f32 %v239_v35  ;;  %v269_v45 = vcvt.s32.f32 %v267_v43 }
 0x107   : > { %243 = vmin.xlane.f32.xlu2 %v242_v22 }
 0x108   : > { %v226_v24 = vpop.xlane.xlu2 %225  ;;  %v230_v29 = vpop.xlane.xlu1 %229 }
 0x109   : > { %vm232_vm5 = vcmp.eq.f32.partialorder %v806_v18, %v226_v24  ;;  %vm234_vm7 = vcmp.eq.f32.partialorder %v801_v17, %v230_v29 }
 0x10a   : > { %v236_v25 = vsel %vm232_vm5, %v768_v6, 128  ;;  %v238_v32 = vsel %vm234_vm7, %v768_v6, 128 }
 0x10b   : > { %v254_v26 = vshra.s32 %v236_v25, 16  ;;  %v282_v33 = vshra.s32 %v238_v32, 16  ;;  %v253_v39 = vand.u32 65535, %v236_v25  ;;  %v281_v47 = vand.u32 65535, %v238_v32 }
 0x10d   : > { %v256_v27 = vcvt.s32.f32 %v254_v26  ;;  %v284_v34 = vcvt.s32.f32 %v282_v33  ;;  %v255_v41 = vcvt.s32.f32 %v253_v39  ;;  %v283_v49 = vcvt.s32.f32 %v281_v47 }
 0x10f   : > { %257 = vmin.xlane.f32.xlu2 %v256_v27 }
 0x117   : > { %271 = vmin.xlane.f32.xlu2 %v270_v31 }
 0x11f   : > { %285 = vmin.xlane.f32.xlu2 %v284_v34 }
 0x17a   : > { %v244_v36 = vpop.xlane.xlu2 %243 }
 0x17b   : > { %vm245_vm8 = vcmp.eq.f32.partialorder %v242_v22, %v244_v36  ;;  %v250_v51 = vcvt.f32.s32 %v244_v36 }
 0x17c   : > { %v246_v38 = vsel %vm245_vm8, %v241_v37, inf  ;;  %vm380_vm8 = vcmp.gt.s32.totalorder %v759_v4, 3 }
 0x17d   : > { %247 = vmin.xlane.f32.xlu2 %v246_v38  ;;  %v251_v53 = vshll.u32 %v250_v51, 16  ;;  %v384_v37 = vsel %vm380_vm8, 1, %v673_v0 }
 0x182   : > { %v258_v40 = vpop.xlane.xlu2 %257 }
 0x183   : > { %vm259_vm9 = vcmp.eq.f32.partialorder %v256_v27, %v258_v40  ;;  %v264_v56 = vcvt.f32.s32 %v258_v40 }
 0x184   : > { %v260_v42 = vsel %vm259_vm9, %v255_v41, inf }
 0x185   : > { %261 = vmin.xlane.f32.xlu2 %v260_v42  ;;  %v265_v59 = vshll.u32 %v264_v56, 16 }
 0x18a   : > { %v272_v44 = vpop.xlane.xlu2 %271 }
 0x18b   : > { %vm273_vm10 = vcmp.eq.f32.partialorder %v270_v31, %v272_v44  ;;  %v278_v62 = vcvt.f32.s32 %v272_v44 }
 0x18c   : > { %v274_v46 = vsel %vm273_vm10, %v269_v45, inf }
 0x18d   : > { %275 = vmin.xlane.f32.xlu0 %v274_v46  ;;  %v279_v7 = vshll.u32 %v278_v62, 16 }
 0x192   : > { %v286_v48 = vpop.xlane.xlu2 %285 }
 0x193   : > { %vm287_vm11 = vcmp.eq.f32.partialorder %v284_v34, %v286_v48  ;;  %v292_v13 = vcvt.f32.s32 %v286_v48 }
 0x194   : > { %v288_v50 = vsel %vm287_vm11, %v283_v49, inf }
 0x195   : > { %289 = vmin.xlane.f32.xlu1 %v288_v50  ;;  %v293_v20 = vshll.u32 %v292_v13, 16 }
 0x1f0   : > { %v248_v52 = vpop.xlane.xlu2 %247 }
 0x1f1   : > { %v249_v54 = vcvt.f32.s32 %v248_v52 }
 0x1f3   : > { %v818_v55 = vadd.s32 %v251_v53, %v249_v54 }
 0x1f5   : > { %vm295_vm12 = vcmp.eq.s32.totalorder %v768_v6, %v818_v55 }
 0x1f6   : > { %v299_v57 = vsel %vm295_vm12, 1e+30, %v786_v12 }
 0x1f7   : > { %303 = vmin.xlane.f32.xlu2 %v299_v57 }
 0x1f8   : > { %v262_v58 = vpop.xlane.xlu2 %261 }
 0x1f9   : > { %v263_v60 = vcvt.f32.s32 %v262_v58 }
 0x1fb   : > { %v826_v61 = vadd.s32 %v265_v59, %v263_v60 }
 0x1fd   : > { %vm296_vm13 = vcmp.eq.s32.totalorder %v768_v6, %v826_v61 }
 0x1fe   : > { %v300_v63 = vsel %vm296_vm13, 1e+30, %v806_v18 }
 0x1ff   : > { %305 = vmin.xlane.f32.xlu0 %v300_v63 }
 0x200   : > { %v276_v5 = vpop.xlane.xlu0 %275 }
 0x201   : > { %v277_v8 = vcvt.f32.s32 %v276_v5 }
 0x203   : > { %v834_v12 = vadd.s32 %v279_v7, %v277_v8 }
 0x205   : > { %vm963_vm14 = vcmp.eq.s32.totalorder %v768_v6, %v834_v12 }
 0x206   : > { %v301_v14 = vsel %vm963_vm14, 1e+30, %v781_v11 }
 0x207   : > { %307 = vmin.xlane.f32.xlu1 %v301_v14 }
 0x208   : > { %v290_v19 = vpop.xlane.xlu1 %289 }
 0x209   : > { %v291_v21 = vcvt.f32.s32 %v290_v19 }
 0x20b   : > { %v842_v18 = vadd.s32 %v293_v20, %v291_v21 }
 0x20d   : > { %vm962_vm15 = vcmp.eq.s32.totalorder %v768_v6, %v842_v18 }
 0x20e   : > { %v302_v22 = vsel %vm962_vm15, 1e+30, %v801_v17 }
 0x20f   : > { %309 = vmin.xlane.f32.xlu2 %v302_v22 }
 0x26a   : > { %v304_v23 = vpop.xlane.xlu2 %303 }
 0x26b   : > { %vm311_vm4 = vcmp.eq.f32.partialorder %v299_v57, %v304_v23 }
 0x26c   : > { %v315_v24 = vsel %vm311_vm4, %v768_v6, 128 }
 0x26d   : > { %v320_v11 = vshra.s32 %v315_v24, 16  ;;  %v319_v38 = vand.u32 65535, %v315_v24 }
 0x26f   : > { %v322_v25 = vcvt.s32.f32 %v320_v11  ;;  %v321_v40 = vcvt.s32.f32 %v319_v38 }
 0x271   : > { %323 = vmin.xlane.f32.xlu0 %v322_v25 }
 0x272   : > { %v306_v26 = vpop.xlane.xlu0 %305 }
 0x273   : > { %vm312_vm5 = vcmp.eq.f32.partialorder %v300_v63, %v306_v26 }
 0x274   : > { %v316_v27 = vsel %vm312_vm5, %v768_v6, 128  ;;  %vm379_vm5 = vcmp.gt.s32.totalorder %v753_v2, 3 }
 0x275   : > { %v334_v28 = vshra.s32 %v316_v27, 16  ;;  %v333_v42 = vand.u32 65535, %v316_v27  ;;  %v383_v53 = vsel %vm379_vm5, 1, %v673_v0 }
 0x277   : > { %v336_v29 = vcvt.s32.f32 %v334_v28  ;;  %v335_v44 = vcvt.s32.f32 %v333_v42 }
 0x279   : > { %337 = vmin.xlane.f32.xlu1 %v336_v29 }
 0x27a   : > { %v308_v30 = vpop.xlane.xlu1 %307 }
 0x27b   : > { %vm313_vm6 = vcmp.eq.f32.partialorder %v301_v14, %v308_v30 }
 0x27c   : > { %v317_v31 = vsel %vm313_vm6, %v768_v6, 128  ;;  %vm382_vm6 = vcmp.gt.s32.totalorder %v757_v3, 3 }
 0x27d   : > { %v348_v17 = vshra.s32 %v317_v31, 16  ;;  %v347_v46 = vand.u32 65535, %v317_v31  ;;  %v386_v54 = vsel %vm382_vm6, 1, %v673_v0 }
 0x27f   : > { %v350_v32 = vcvt.s32.f32 %v348_v17  ;;  %v349_v48 = vcvt.s32.f32 %v347_v46 }
 0x281   : > { %351 = vmin.xlane.f32.xlu2 %v350_v32 }
 0x282   : > { %v310_v33 = vpop.xlane.xlu2 %309 }
 0x283   : > { %vm314_vm7 = vcmp.eq.f32.partialorder %v302_v22, %v310_v33 }
 0x284   : > { %v318_v34 = vsel %vm314_vm7, %v768_v6, 128  ;;  %vm381_vm7 = vcmp.gt.s32.totalorder %v751_v1, 3 }
 0x285   : > { %v362_v35 = vshra.s32 %v318_v34, 16  ;;  %v361_v49 = vand.u32 65535, %v318_v34  ;;  %v385_v56 = vsel %vm381_vm7, 1, %v673_v0 }
 0x287   : > { %v364_v36 = vcvt.s32.f32 %v362_v35  ;;  %v363_v51 = vcvt.s32.f32 %v361_v49 }
 0x289   : > { %365 = vmin.xlane.f32.xlu0 %v364_v36 }
 0x29d   : > { %391 = vperm.xlu0 %595, %v384_v37  }
 0x2e4   : > { %v324_v39 = vpop.xlane.xlu0 %323 }
 0x2e5   : > { %vm325_vm9 = vcmp.eq.f32.partialorder %v322_v25, %v324_v39  ;;  %v330_v60 = vcvt.f32.s32 %v324_v39 }
 0x2e6   : > { %v326_v41 = vsel %vm325_vm9, %v321_v40, inf }
 0x2e7   : > { %327 = vmin.xlane.f32.xlu1 %v326_v41  ;;  %v331_v5 = vshll.u32 %v330_v60, 16 }
 0x2ec   : > { %v338_v43 = vpop.xlane.xlu1 %337 }
 0x2ed   : > { %vm339_vm10 = vcmp.eq.f32.partialorder %v336_v29, %v338_v43  ;;  %v344_v62 = vcvt.f32.s32 %v338_v43 }
 0x2ee   : > { %v340_v45 = vsel %vm339_vm10, %v335_v44, inf }
 0x2ef   : > { %341 = vmin.xlane.f32.xlu2 %v340_v45  ;;  %v345_v7 = vshll.u32 %v344_v62, 16 }
 0x2f4   : > { %v352_v47 = vpop.xlane.xlu2 %351 }
 0x2f5   : > { %vm353_vm11 = vcmp.eq.f32.partialorder %v350_v32, %v352_v47  ;;  %v358_v14 = vcvt.f32.s32 %v352_v47 }
 0x2f6   : > { %v354_v4 = vsel %vm353_vm11, %v349_v48, inf }
 0x2f7   : > { %355 = vmin.xlane.f32.xlu0 %v354_v4  ;;  %v359_v23 = vshll.u32 %v358_v14, 16 }
 0x2fc   : > { %v366_v50 = vpop.xlane.xlu0 %365 }
 0x2fd   : > { %vm367_vm4 = vcmp.eq.f32.partialorder %v364_v36, %v366_v50  ;;  %v372_v1 = vcvt.f32.s32 %v366_v50 }
 0x2fe   : > { %v368_v52 = vsel %vm367_vm4, %v363_v51, inf }
 0x2ff   : > { %369 = vmin.xlane.f32.xlu1 %v368_v52  ;;  %v373_v24 = vshll.u32 %v372_v1, 16 }
 0x307   : > { %388 = vperm.xlu2 %597, %v383_v53  }
 0x30b   : > { %397 = vperm.xlu0 %595, %v386_v54  }
 0x30f   : > { %v392_v58 = vpop.permute.xlu0 %391 }
 0x310   : > { %vm400_vm4 = vcmp.eq.s32.totalorder %v392_v58, 1 }
 0x311   : > { %vm404_vm0 = vmand %vm216_vm3, %vm400_vm4 }
 0x318   : > { %394 = vperm.xlu1 %596, %v385_v56  }
 0x35a   : > { %v328_v59 = vpop.xlane.xlu1 %327 }
 0x35b   : > { %v329_v2 = vcvt.f32.s32 %v328_v59 }
 0x35d   : > { %v332_v8 = vadd.s32 %v331_v5, %v329_v2 }
 0x35f   : > { %vm375_vm9 = vcmp.eq.s32.totalorder %v768_v6, %v332_v8 }
 0x360   : > { %vm407_vm5 = vmor %vm295_vm12, %vm375_vm9  ;;  %vm967_vm12 = vcmp.lt.s32.totalorder %v768_v6, %v790_v15 }
 0x362   : > { %v342_v57 = vpop.xlane.xlu2 %341 }
 0x363   : > { %v343_v63 = vcvt.f32.s32 %v342_v57 }
 0x365   : > { %v346_v19 = vadd.s32 %v345_v7, %v343_v63 }
 0x367   : > { %vm376_vm10 = vcmp.eq.s32.totalorder %v768_v6, %v346_v19 }
 0x368   : > { %vm408_vm6 = vmor %vm296_vm13, %vm376_vm10  ;;  %vm968_vm13 = vcmp.eq.s32.totalorder %v768_v6, %v834_v12 }
 0x369   : > { %vm412_vm14 = vmand %vm404_vm0, %vm408_vm6 }
 0x36a   : > { %v356_v3 = vpop.xlane.xlu0 %355  ;;  %v389_v13 = vpop.permute.xlu2 %388 }
 0x36b   : > { %v357_v21 = vcvt.f32.s32 %v356_v3  ;;  %vm399_vm8 = vcmp.eq.s32.totalorder %v389_v13, 1 }
 0x36c   : > { %vm403_vm11 = vmand %vm215_vm1, %vm399_vm8 }
 0x36d   : > { %v360_v11 = vadd.s32 %v359_v23, %v357_v21  ;;  %vm411_vm7 = vmand %vm403_vm11, %vm407_vm5  ;;  %vm969_vm11 = vcmp.eq.s32.totalorder %v768_v6, %v842_v18 }
 0x36e   : > { %vm415_vm8 = vmpackc.low %vm412_vm14, %vm411_vm7  ;;  %vm970_vm14 = vcmp.lt.s32.totalorder %v768_v6, %v770_v9 }
 0x36f   : > { %vm377_vm1 = vcmp.eq.s32.totalorder %v768_v6, %v360_v11  ;;  %v417_v15 = vsel %vm415_vm8, 16711935, %v673_v0 }
 0x370   : > { %vm409_vm10 = vmor %vm968_vm13, %vm377_vm1 }
 0x372   : > { %v370_v20 = vpop.xlane.xlu1 %369 }
 0x373   : > { %v371_v22 = vcvt.f32.s32 %v370_v20 }
 0x375   : > { %v374_v26 = vadd.s32 %v373_v24, %v371_v22 }
 0x377   : > { %vm378_vm2 = vcmp.eq.s32.totalorder %v768_v6, %v374_v26 }
 0x378   : > { %vm410_vm3 = vmor %vm969_vm11, %vm378_vm2 }
 0x37d   : > { %v398_v25 = vpop.permute.xlu0 %397 }
 0x37e   : > { %vm402_vm15 = vcmp.eq.s32.totalorder %v398_v25, 1 }
 0x37f   : > { %vm406_vm9 = vmand %vm967_vm12, %vm402_vm15 }
 0x380   : > { %vm414_vm0 = vmand %vm406_vm9, %vm410_vm3 }
 0x38a   : > { %v395_v10 = vpop.permute.xlu1 %394 }
 0x38b   : > { %vm401_vm4 = vcmp.eq.s32.totalorder %v395_v10, 1 }
 0x38c   : > { %vm405_vm5 = vmand %vm970_vm14, %vm401_vm4 }
 0x38d   : > { %vm413_vm6 = vmand %vm405_vm5, %vm409_vm10 }
 0x38e   : > { %vm416_vm7 = vmpackc.low %vm414_vm0, %vm413_vm6 }
 0x38f   : > { %v418_v16 = vsel %vm416_vm7, 16711935, %v673_v0 }
 0x390   : > { %v419_v55 = vpack.c.b8 %v418_v16, %v417_v15 }
 0x392   : > { %vm420_vm15 = vnez %v419_v55 }
 0x393   : > { %v421_v61 = vsel %vm420_vm15, 16843009, %v673_v0 }
 0x394   : > { %v422_v12 = vunpack.c.0.s8 %v421_v61  ;;  %v423_v18 = vunpack.c.1.s8 %v421_v61  ;;  %v424_v27 = vunpack.c.2.s8 %v421_v61  ;;  %v425_v28 = vunpack.c.3.s8 %v421_v61 }
 0x396   : > { %v426_v29 = vpack.c.b16 %v422_v12, %v422_v12  ;;  %v428_v6 = vpack.c.b16 %v423_v18, %v423_v18  ;;  %v430_v9 = vpack.c.b16 %v424_v27, %v424_v27  ;;  %v432_v30 = vpack.c.b16 %v425_v28, %v425_v28 }
 0x398   : > { %v427_v31 = vpack.c.b8 %v426_v29, %v426_v29  ;;  %v429_v17 = vpack.c.b8 %v428_v6, %v428_v6  ;;  %v431_v32 = vpack.c.b8 %v430_v9, %v430_v9  ;;  %v433_v33 = vpack.c.b8 %v432_v30, %v432_v30 }
 0x399   : > { %445 = sbr.rel (!%p730_p5) target bundleno = 957 (0x3bd), region = 32 }
 0x39a   : > { %434 = vst [vmem:[%s165_s6] sm:$0x3] %v427_v31 }
 0x39b   : > { %435 = vst [vmem:[%s165_s6 + $0x2] sm:$0x3] %v429_v17 }
 0x39c   : > { %436 = vst [vmem:[%s165_s6 + $0x4] sm:$0x3] %v431_v32 }
 0x39d   : > { %437 = vst [vmem:[%s165_s6 + $0x6] sm:$0x3] %v433_v33 }
 0x39e   : > { %s977_s8 = smov (!%p448_p12, %s447_s8), 4 }
 0x39f   : > { %s546_s14 = sshll.u32 %s977_s8, 1 }
 0x3a0   : > { %s451_s16 = ssub.s32 8, %s546_s14 }
 0x3a1   : > { %s452_s17 = sshll.u32 %s451_s16, 4 }
 0x3a2   : > { %453 = vsyncadd %s898_s7, %s452_s17  ;;  %p907_p13 = scmp.ne.s32.totalorder %s546_s14, 0  ;;  %s553_s19 = sshll.u32 %s713_s13, 3 }
 0x3a3   : > { %s456_s21 = scalar_lea.hbm %s960_s2, %s553_s19  ;;  %s458_s25 = sshll.u32 %s165_s6, 4  ;;  %s915_s25 = int_to_ptr.vmem [resolvable:$true] %s458_s25 }
 0x3a4   : > { %s460_s26 = sshll.u32 %s456_s21, 4  ;;  %s550_s27 = sshll.u32 %s977_s8, 5  ;;  %s917_s26 = int_to_ptr.hbm [resolvable:$true] %s460_s26 }
 0x3a5   : > { %s598_s28 = sshra.s32 %s915_s25, 4  ;;  %s600_s29 = sshrl.u32 %s550_s27, 4  ;;  %s599_s28 = int_to_ptr.vmem [resolvable:$true] %s598_s28 }
 0x3a6   : > { %s605_s30 = scalar_lea.vmem %s599_s28, %s600_s29  ;;  %s674_s13 = smov [#allocation2]  }
 0x3a7   : > { %p606_p0 = scmp.ne.s32.totalorder %s599_s28, %s605_s30  ;;  %s609_s3 = scalar_lea.vmem %s674_s13, 16 }
 0x3a8   : > { %p611_p3 = scmp.lt.s32.totalorder %s609_s3, %s605_s30 }
 0x3a9   : > { %p607_p1 = pnand %p606_p0, %p907_p13 }
 0x3ab   : > { %p608_p2 = pneg %p607_p1 }
 0x3ad   : > { %p613_p4 = pnand %p611_p3, %p608_p2 }
 0x3af   : > { %616 = shalt.err (!%p613_p4)
}
 0x3b0   : > { %s617_s4 = sshra.s32 %s917_s26, 4  ;;  %s628_s16 = scalar_lea.hbm %s960_s2, 12  ;;  %s618_s4 = int_to_ptr.hbm [resolvable:$true] %s617_s4 }
 0x3b1   : > { %s624_s5 = scalar_lea.hbm %s618_s4, %s600_s29  ;;  %p629_p9 = scmp.lt.s32.totalorder %s618_s4, %s960_s2 }
 0x3b2   : > { %p625_p5 = scmp.ne.s32.totalorder %s618_s4, %s624_s5  ;;  %p630_p10 = scmp.lt.s32.totalorder %s628_s16, %s624_s5 }
 0x3b4   : > { %p626_p7 = pnand %p625_p5, %p907_p13  ;;  %p631_p11 = por %p630_p10, %p629_p9 }
 0x3b6   : > { %p627_p8 = pneg %p626_p7 }
 0x3b8   : > { %p632_p12 = pnand %p631_p11, %p627_p8 }
 0x3ba   : > { %635 = shalt.err (!%p632_p12)
}
 0x3bb   : > { %s675_s23 = smov 32   ;;  %s676_s24 = smov 2  }
 0x3bc   : > { %466 = dma.vmem_to_hbm [thread:$0]  (%p907_p13), %s915_s25, %s550_s27, %s917_s26, %s898_s7, %s675_s23, %s675_s23, %s676_s24  }
 0x3bd PF: > { %p559_p0 = scmp.ge.s32.totalorder %s671_s12, 2  ;;  %s475_s21 = sand.u32 1, %s659_s9  }
 0x3be   : > { %s476_s28 = scalar_lea.sflag [#allocation3], %s475_s21 }
 0x3bf   : > { %p556_p1 = pnand %p559_p0, %p734_p6 }
 0x3c1   : > { %p557_p2 = pneg %p556_p1 }
 0x3c3   : > { %654 = dma.done.wait (%p557_p2), %s476_s28, 128  }
 0x3c4   : > { %656 = vsyncadd (%p557_p2), %s476_s28, 4294967168  ;;  %p12_p3 = scmp.ge.s32.totalorder %s717_s15, 4   ;;  %s972_s9 = smov %s663_s10 }
 0x3c5   : > { %s973_s10 = smov %s667_s11  ;;  %s974_s11 = smov %s728_s18 }
 0x3c6   : > { %s975_s12 = smov %s717_s15  ;;  %14 = sbr.rel (!%p12_p3) target bundleno = 3 (0x3), region = 66 }
 0x3cb   :  { %482 = vsyncpa [#allocation3], 1 }
 0x3cc   :  { %484 = vsyncpa [#allocation3 + $0x1], 1 }

</bundles_post_ra>
